<compile_context>
chip_gen: v5e
topology: v5e:2x2
jax: 0.10.0
libtpu: 0.0.40
codegen_flags: <defaults>
</compile_context>

<pallas_src>
import jax
import jax.numpy as jnp
import numpy as np
from jax.experimental import pallas as pl
from jax.experimental.pallas import tpu as pltpu


# ----------------------------- policy kernel --------------------------------
def _sigmoid(v):
    return 1.0 / (1.0 + jnp.exp(-v))


def make_policy_kernel(hidden):
    H = hidden

    def policy_kernel(feat_ref, h_ref,
                      wenc_ref, benc_ref,
                      wx3_ref, wh3_ref, bx3_ref, bh3_ref,
                      wa_ref, ba_ref,
                      rtab_ref, ctab_ref,
                      hx_ref, off_ref):
        # bf16 matmul operands (weights are stored bf16); f32 accumulation via
        # preferred_element_type; all gate / elementwise math stays f32.
        feat = feat_ref[...].astype(jnp.bfloat16)       # (B, F)
        h = h_ref[...]                                   # (B, H) f32 (carried)

        # state encoder: Linear + ReLU
        x = jnp.dot(feat, wenc_ref[...],
                    preferred_element_type=jnp.float32) + benc_ref[...]
        x = jnp.maximum(x, 0.0)

        # fused GRU cell: 2 matmuls instead of 6; gate order [ r | z | n ].
        # NOTE: at production sizes choose H as a multiple of 128 so the r/z/n
        # lane slices below land on vreg tile boundaries (free views, no XLU
        # relayout); the demo H=32 splits a single vreg but still lowers fine.
        gx = jnp.dot(x.astype(jnp.bfloat16), wx3_ref[...],
                     preferred_element_type=jnp.float32) + bx3_ref[...]   # (B, 3H)
        gh = jnp.dot(h.astype(jnp.bfloat16), wh3_ref[...],
                     preferred_element_type=jnp.float32) + bh3_ref[...]   # (B, 3H)
        r = _sigmoid(gx[:, 0:H] + gh[:, 0:H])
        z = _sigmoid(gx[:, H:2 * H] + gh[:, H:2 * H])
        n = jnp.tanh(gx[:, 2 * H:3 * H] + r * gh[:, 2 * H:3 * H])
        h_new = (1.0 - z) * n + z * h                    # (B, H) f32

        # actor head; greedy action = argmax over logits (softmax is monotonic,
        # so it is dropped entirely -> exact and cheaper).  Ties resolve to the
        # lowest index (torch.argmax first-occurrence behaviour).
        logits = jnp.dot(h_new.astype(jnp.bfloat16), wa_ref[...],
                         preferred_element_type=jnp.float32) + ba_ref[...]   # (B, A)
        a_dim = logits.shape[-1]
        idx = jax.lax.broadcasted_iota(jnp.int32, logits.shape, 1)
        is_max = logits >= jnp.max(logits, axis=-1, keepdims=True)
        action = jnp.min(jnp.where(is_max, idx, a_dim), axis=-1, keepdims=True)  # (B,1)

        # standard-action table lookup + floor(coord*(img-patch)) fused in-kernel:
        # rtab/ctab are per-action precomputed pixel offsets (f32, exact ints).
        sel = idx == action                                      # (B, A), one-hot
        roff = jnp.sum(jnp.where(sel, rtab_ref[...], 0.0), axis=-1, keepdims=True)
        coff = jnp.sum(jnp.where(sel, ctab_ref[...], 0.0), axis=-1, keepdims=True)

        hx_ref[...] = h_new
        # Tiny (B,2) int32 output; it is immediately scalar-prefetched (SMEM)
        # by the crop kernel.  (A direct SMEM output would need scalar stores,
        # which these vector-computed values cannot portably provide.)
        off_ref[...] = jnp.concatenate([roff, coff], axis=-1).astype(jnp.int32)

    return policy_kernel


def run_policy(feat, hx, params, rtab, ctab):
    # Gridless single-step call; at large B this could be gridded over the
    # batch with dimension_semantics=("parallel",) to feed both v7x TCs.
    B = feat.shape[0]
    H = hx.shape[1]
    vmem = pl.BlockSpec(memory_space=pltpu.MemorySpace.VMEM)
    inputs = (feat, hx,
              params["wenc"], params["benc"],
              params["wx3"], params["wh3"], params["bx3"], params["bh3"],
              params["wa"], params["ba"],
              rtab, ctab)
    hx_new, offs = pl.pallas_call(
        make_policy_kernel(H),
        out_shape=(jax.ShapeDtypeStruct((B, H), jnp.float32),
                   jax.ShapeDtypeStruct((B, 2), jnp.int32)),
        in_specs=[vmem] * len(inputs),
        out_specs=(vmem, vmem),
    )(*inputs)
    return hx_new, offs


# ------------------------------ crop kernel ---------------------------------
def make_crop_kernel(patch, batch_block, total_b):
    def crop_kernel(offs_ref, img_hbm, out_ref, sems):
        g = pl.program_id(0)
        base = g * batch_block
        copies = []
        for i in range(batch_block):
            # Clamp so padded tail slots (when B % batch_block != 0) re-fetch
            # the last valid image instead of reading out of bounds; their
            # destination rows fall in the discarded padding of the out block.
            b = jnp.minimum(base + i, total_b - 1)
            r = offs_ref[b, 0]
            c = offs_ref[b, 1]
            # Data-dependent gather of the (C, patch, patch) window, DMA'd
            # straight from HBM into the pipelined output block (no VMEM
            # scratch, no extra VMEM->VMEM copy).
            copies.append(pltpu.make_async_copy(
                img_hbm.at[b, :, pl.ds(r, patch), pl.ds(c, patch)],
                out_ref.at[i], sems.at[i]))
        # Start ALL gathers of this block, then wait: keeps `batch_block` DMAs
        # in flight so the many small strided segments hide HBM latency and the
        # fixed per-grid-step overhead is amortized over the whole block.
        for cp in copies:
            cp.start()
        for cp in copies:
            cp.wait()
        # NOTE: offsets are generally not 128-byte aligned for arbitrary
        # (img_size - patch, action grid) combinations, so no pl.multiple_of
        # hint is emitted here.
    return crop_kernel


def run_crop(imgs, offs, patch, batch_block=8):
    B, C, Himg, Wimg = imgs.shape
    bb = min(batch_block, B)
    grid = pl.cdiv(B, bb)
    # VMEM footprint per step is only the double-buffered output block
    # (bb*C*patch*patch*4 bytes, <3 MiB at real sizes with bb=8), comfortably
    # inside the 32 MiB scoped default on every generation including v7x
    # (64 MiB physical VMEM) -- no explicit vmem_limit_bytes needed.
    return pl.pallas_call(
        make_crop_kernel(patch, bb, B),
        out_shape=jax.ShapeDtypeStruct((B, C, patch, patch), imgs.dtype),
        grid_spec=pltpu.PrefetchScalarGridSpec(
            num_scalar_prefetch=1,
            grid=(grid,),
            in_specs=[pl.BlockSpec(memory_space=pl.ANY)],
            out_specs=pl.BlockSpec((bb, C, patch, patch),
                                   lambda g, offs: (g, 0, 0, 0)),
            scratch_shapes=[pltpu.SemaphoreType.DMA((bb,))]),
        # each grid step is self-contained -> safe to shard batch blocks across
        # the two TensorCores on v7x; neutral on single-TC v5e/v6e.
        compiler_params=pltpu.CompilerParams(dimension_semantics=("parallel",)),
    )(offs, imgs)


# ---------------------------- Focuser forward -------------------------------
def build_offset_tables(action_dim, img_size, patch):
    """Per-action pixel offsets.

    Matches Focuser.standard_actions_set[action_dim] (row-major [row, col]
    fraction grid stored as float32 by torch.Tensor) followed by get_patch's
    floor(standard_action * (img_size - patch)).  Fractions are computed in
    float64 then cast to float32 (exactly what torch.Tensor does with python
    floats); the multiply + floor are done in float32 to match torch
    bit-for-bit.  Column 0 -> row (H) offset, column 1 -> col (W) offset.
    """
    k = int(round(action_dim ** 0.5))
    coords = (np.arange(k, dtype=np.float64) / np.float64(k - 1)).astype(np.float32)
    table = np.stack(np.meshgrid(coords, coords, indexing="ij"),
                     axis=-1).reshape(action_dim, 2)                  # (A, 2)
    offs = np.floor(table * np.float32(img_size - patch)).astype(np.float32)
    rtab = jnp.asarray(offs[:, 0].reshape(1, action_dim))
    ctab = jnp.asarray(offs[:, 1].reshape(1, action_dim))
    return rtab, ctab


def focuser_forward(feature, imgs, params, patch_size, action_dim, hx=None):
    B = feature.shape[0]
    H_hidden = params["wh3"].shape[0]
    if hx is None:
        hx = jnp.zeros((B, H_hidden), jnp.float32)   # carried hidden state input

    img_size = imgs.shape[2]
    rtab, ctab = build_offset_tables(action_dim, img_size, patch_size)

    # 1)+2) policy.select_action + _get_standard_action + offset conversion,
    #        all fused into ONE Pallas kernel -> (hx, int32 (row,col) offsets)
    hx_new, offs = run_policy(feature, hx, params, rtab, ctab)

    # 3) get_patch: per-image crop at the selected offsets (Pallas DMA kernel,
    #    batched multi-DMA gather)
    key_s = run_crop(imgs, offs, patch_size)
    return key_s, hx_new


# --------------------------------- main --------------------------------------
def init_params(key, feature_dim, hidden, action_dim):
    ks = jax.random.split(key, 8)
    s = 0.1
    f32, bf16 = jnp.float32, jnp.bfloat16
    # Matmul weights are stored in bf16 (halves the HBM->VMEM weight traffic
    # that dominates the policy kernel at production sizes); biases and all
    # non-matmul math stay f32.
    return {
        "wenc": (s * jax.random.normal(ks[0], (feature_dim, hidden), f32)).astype(bf16),
        "benc": s * jax.random.normal(ks[1], (1, hidden), f32),
        # fused GRU weights / biases, gate order [ r | z | n ]
        "wx3": (s * jax.random.normal(ks[2], (hidden, 3 * hidden), f32)).astype(bf16),
        "wh3": (s * jax.random.normal(ks[3], (hidden, 3 * hidden), f32)).astype(bf16),
        "bx3": s * jax.random.normal(ks[4], (1, 3 * hidden), f32),
        "bh3": s * jax.random.normal(ks[5], (1, 3 * hidden), f32),
        "wa": (s * jax.random.normal(ks[6], (hidden, action_dim), f32)).astype(bf16),
        "ba": s * jax.random.normal(ks[7], (1, action_dim), f32),
    }


if __name__ == "__main__":
    B = 2
    C = 4
    IMG = 16
    PATCH = 8          # "size" of the Focuser / PatchSampler, scaled down
    FEAT = 32
    HIDDEN = 32
    ACTION_DIM = 25    # 5x5 standard action grid

    key = jax.random.PRNGKey(0)
    k_feat, k_img, k_par = jax.random.split(key, 3)

    feature = jax.random.normal(k_feat, (B, FEAT), jnp.float32)
    imgs = jax.random.normal(k_img, (B, C, IMG, IMG), jnp.float32)
    params = init_params(k_par, FEAT, HIDDEN, ACTION_DIM)

    key_s, hx = focuser_forward(feature, imgs, params, PATCH, ACTION_DIM)
    jax.block_until_ready((key_s, hx))

    assert key_s.shape == (B, C, PATCH, PATCH)
    assert hx.shape == (B, HIDDEN)
    print("KERNEL_OK")
</pallas_src>

<mosaic_0001>
module attributes {stable_mosaic.version = 11 : i64} {
  func.func @policy_kernel(%arg0: memref<2x32xf32, #tpu.memory_space<vmem>>, %arg1: memref<2x32xf32, #tpu.memory_space<vmem>>, %arg2: memref<32x32xbf16, #tpu.memory_space<vmem>>, %arg3: memref<1x32xf32, #tpu.memory_space<vmem>>, %arg4: memref<32x96xbf16, #tpu.memory_space<vmem>>, %arg5: memref<32x96xbf16, #tpu.memory_space<vmem>>, %arg6: memref<1x96xf32, #tpu.memory_space<vmem>>, %arg7: memref<1x96xf32, #tpu.memory_space<vmem>>, %arg8: memref<32x25xbf16, #tpu.memory_space<vmem>>, %arg9: memref<1x25xf32, #tpu.memory_space<vmem>>, %arg10: memref<1x25xf32, #tpu.memory_space<vmem>>, %arg11: memref<1x25xf32, #tpu.memory_space<vmem>>, %arg12: memref<2x32xf32, #tpu.memory_space<vmem>>, %arg13: memref<2x2xi32, #tpu.memory_space<vmem>>) attributes {dimension_semantics = [], scalar_prefetch = 0 : i64, scratch_operands = 0 : i64, tpu.core_type = #tpu.core_type<tc>} {
    %c0 = arith.constant 0 : index
    %c0_0 = arith.constant 0 : index
    %0 = vector.load %arg0[%c0, %c0_0] : memref<2x32xf32, #tpu.memory_space<vmem>>, vector<2x32xf32>
    %1 = arith.truncf %0 : vector<2x32xf32> to vector<2x32xbf16>
    %c0_1 = arith.constant 0 : index
    %c0_2 = arith.constant 0 : index
    %2 = vector.load %arg1[%c0_1, %c0_2] : memref<2x32xf32, #tpu.memory_space<vmem>>, vector<2x32xf32>
    %c0_3 = arith.constant 0 : index
    %c0_4 = arith.constant 0 : index
    %3 = vector.load %arg2[%c0_3, %c0_4] : memref<32x32xbf16, #tpu.memory_space<vmem>>, vector<32x32xbf16>
    %cst = arith.constant dense<0.000000e+00> : vector<2x32xf32>
    %4 = tpu.matmul %1, %3, %cst {dimension_numbers = #tpu.dot_dimension_numbers<[1], [0], [0], [1], [0, 0, 1, 1], [], []>} : vector<2x32xbf16>, vector<32x32xbf16>, vector<2x32xf32> -> vector<2x32xf32>
    %c0_5 = arith.constant 0 : index
    %c0_6 = arith.constant 0 : index
    %5 = vector.load %arg3[%c0_5, %c0_6] : memref<1x32xf32, #tpu.memory_space<vmem>>, vector<1x32xf32>
    %6 = vector.broadcast %5 : vector<1x32xf32> to vector<2x32xf32>
    %7 = arith.addf %4, %6 : vector<2x32xf32>
    %cst_7 = arith.constant 0.000000e+00 : f32
    %8 = vector.broadcast %cst_7 : f32 to vector<2x32xf32>
    %9 = arith.maximumf %7, %8 : vector<2x32xf32>
    %10 = arith.truncf %9 : vector<2x32xf32> to vector<2x32xbf16>
    %c0_8 = arith.constant 0 : index
    %c0_9 = arith.constant 0 : index
    %11 = vector.load %arg4[%c0_8, %c0_9] : memref<32x96xbf16, #tpu.memory_space<vmem>>, vector<32x96xbf16>
    %cst_10 = arith.constant dense<0.000000e+00> : vector<2x96xf32>
    %12 = tpu.matmul %10, %11, %cst_10 {dimension_numbers = #tpu.dot_dimension_numbers<[1], [0], [0], [1], [0, 0, 1, 1], [], []>} : vector<2x32xbf16>, vector<32x96xbf16>, vector<2x96xf32> -> vector<2x96xf32>
    %c0_11 = arith.constant 0 : index
    %c0_12 = arith.constant 0 : index
    %13 = vector.load %arg6[%c0_11, %c0_12] : memref<1x96xf32, #tpu.memory_space<vmem>>, vector<1x96xf32>
    %14 = vector.broadcast %13 : vector<1x96xf32> to vector<2x96xf32>
    %15 = arith.addf %12, %14 : vector<2x96xf32>
    %16 = arith.truncf %2 : vector<2x32xf32> to vector<2x32xbf16>
    %c0_13 = arith.constant 0 : index
    %c0_14 = arith.constant 0 : index
    %17 = vector.load %arg5[%c0_13, %c0_14] : memref<32x96xbf16, #tpu.memory_space<vmem>>, vector<32x96xbf16>
    %cst_15 = arith.constant dense<0.000000e+00> : vector<2x96xf32>
    %18 = tpu.matmul %16, %17, %cst_15 {dimension_numbers = #tpu.dot_dimension_numbers<[1], [0], [0], [1], [0, 0, 1, 1], [], []>} : vector<2x32xbf16>, vector<32x96xbf16>, vector<2x96xf32> -> vector<2x96xf32>
    %c0_16 = arith.constant 0 : index
    %c0_17 = arith.constant 0 : index
    %19 = vector.load %arg7[%c0_16, %c0_17] : memref<1x96xf32, #tpu.memory_space<vmem>>, vector<1x96xf32>
    %20 = vector.broadcast %19 : vector<1x96xf32> to vector<2x96xf32>
    %21 = arith.addf %18, %20 : vector<2x96xf32>
    %22 = vector.extract_strided_slice %15 {offsets = [0, 0], sizes = [2, 32], strides = [1, 1]} : vector<2x96xf32> to vector<2x32xf32>
    %23 = vector.extract_strided_slice %21 {offsets = [0, 0], sizes = [2, 32], strides = [1, 1]} : vector<2x96xf32> to vector<2x32xf32>
    %24 = arith.addf %22, %23 : vector<2x32xf32>
    %cst_18 = arith.constant 0.000000e+00 : f32
    %25 = vector.broadcast %cst_18 : f32 to vector<2x32xf32>
    %26 = arith.subf %25, %24 : vector<2x32xf32>
    %27 = math.exp %26 : vector<2x32xf32>
    %cst_19 = arith.constant 1.000000e+00 : f32
    %28 = vector.broadcast %cst_19 : f32 to vector<2x32xf32>
    %29 = arith.addf %28, %27 : vector<2x32xf32>
    %cst_20 = arith.constant 1.000000e+00 : f32
    %30 = vector.broadcast %cst_20 : f32 to vector<2x32xf32>
    %31 = arith.divf %30, %29 : vector<2x32xf32>
    %32 = vector.extract_strided_slice %15 {offsets = [0, 32], sizes = [2, 32], strides = [1, 1]} : vector<2x96xf32> to vector<2x32xf32>
    %33 = vector.extract_strided_slice %21 {offsets = [0, 32], sizes = [2, 32], strides = [1, 1]} : vector<2x96xf32> to vector<2x32xf32>
    %34 = arith.addf %32, %33 : vector<2x32xf32>
    %cst_21 = arith.constant 0.000000e+00 : f32
    %35 = vector.broadcast %cst_21 : f32 to vector<2x32xf32>
    %36 = arith.subf %35, %34 : vector<2x32xf32>
    %37 = math.exp %36 : vector<2x32xf32>
    %cst_22 = arith.constant 1.000000e+00 : f32
    %38 = vector.broadcast %cst_22 : f32 to vector<2x32xf32>
    %39 = arith.addf %38, %37 : vector<2x32xf32>
    %cst_23 = arith.constant 1.000000e+00 : f32
    %40 = vector.broadcast %cst_23 : f32 to vector<2x32xf32>
    %41 = arith.divf %40, %39 : vector<2x32xf32>
    %42 = vector.extract_strided_slice %15 {offsets = [0, 64], sizes = [2, 32], strides = [1, 1]} : vector<2x96xf32> to vector<2x32xf32>
    %43 = vector.extract_strided_slice %21 {offsets = [0, 64], sizes = [2, 32], strides = [1, 1]} : vector<2x96xf32> to vector<2x32xf32>
    %44 = arith.mulf %31, %43 : vector<2x32xf32>
    %45 = arith.addf %42, %44 : vector<2x32xf32>
    %46 = math.tanh %45 : vector<2x32xf32>
    %cst_24 = arith.constant 1.000000e+00 : f32
    %47 = vector.broadcast %cst_24 : f32 to vector<2x32xf32>
    %48 = arith.subf %47, %41 : vector<2x32xf32>
    %49 = arith.mulf %48, %46 : vector<2x32xf32>
    %50 = arith.mulf %41, %2 : vector<2x32xf32>
    %51 = arith.addf %49, %50 : vector<2x32xf32>
    %52 = arith.truncf %51 : vector<2x32xf32> to vector<2x32xbf16>
    %c0_25 = arith.constant 0 : index
    %c0_26 = arith.constant 0 : index
    %53 = vector.load %arg8[%c0_25, %c0_26] : memref<32x25xbf16, #tpu.memory_space<vmem>>, vector<32x25xbf16>
    %cst_27 = arith.constant dense<0.000000e+00> : vector<2x25xf32>
    %54 = tpu.matmul %52, %53, %cst_27 {dimension_numbers = #tpu.dot_dimension_numbers<[1], [0], [0], [1], [0, 0, 1, 1], [], []>} : vector<2x32xbf16>, vector<32x25xbf16>, vector<2x25xf32> -> vector<2x25xf32>
    %c0_28 = arith.constant 0 : index
    %c0_29 = arith.constant 0 : index
    %55 = vector.load %arg9[%c0_28, %c0_29] : memref<1x25xf32, #tpu.memory_space<vmem>>, vector<1x25xf32>
    %56 = vector.broadcast %55 : vector<1x25xf32> to vector<2x25xf32>
    %57 = arith.addf %54, %56 : vector<2x25xf32>
    %58 = tpu.iota {dimensions = array<i32: 1>} : vector<2x25xi32>
    %cst_30 = arith.constant dense<0xFF800000> : vector<2xf32>
    %59 = vector.multi_reduction <maximumf>, %57, %cst_30 [1] : vector<2x25xf32> to vector<2xf32>
    %60 = vector.shape_cast %59 : vector<2xf32> to vector<2x1xf32>
    %61 = vector.broadcast %60 : vector<2x1xf32> to vector<2x25xf32>
    %62 = arith.cmpf oge, %57, %61 : vector<2x25xf32>
    %c25_i32 = arith.constant 25 : i32
    %63 = vector.broadcast %c25_i32 : i32 to vector<2x25xi32>
    %64 = arith.select %62, %58, %63 : vector<2x25xi1>, vector<2x25xi32>
    %cst_31 = arith.constant dense<2147483647> : vector<2xi32>
    %65 = vector.multi_reduction <minsi>, %64, %cst_31 [1] : vector<2x25xi32> to vector<2xi32>
    %66 = vector.shape_cast %65 : vector<2xi32> to vector<2x1xi32>
    %67 = vector.broadcast %66 : vector<2x1xi32> to vector<2x25xi32>
    %68 = arith.cmpi eq, %58, %67 : vector<2x25xi32>
    %c0_32 = arith.constant 0 : index
    %c0_33 = arith.constant 0 : index
    %69 = vector.load %arg10[%c0_32, %c0_33] : memref<1x25xf32, #tpu.memory_space<vmem>>, vector<1x25xf32>
    %cst_34 = arith.constant 0.000000e+00 : f32
    %70 = vector.shape_cast %69 : vector<1x25xf32> to vector<1x25xf32>
    %71 = vector.broadcast %70 : vector<1x25xf32> to vector<2x25xf32>
    %72 = vector.broadcast %cst_34 : f32 to vector<2x25xf32>
    %73 = arith.select %68, %71, %72 : vector<2x25xi1>, vector<2x25xf32>
    %cst_35 = arith.constant dense<0.000000e+00> : vector<2xf32>
    %74 = vector.multi_reduction <add>, %73, %cst_35 [1] : vector<2x25xf32> to vector<2xf32>
    %75 = vector.shape_cast %74 : vector<2xf32> to vector<2x1xf32>
    %c0_36 = arith.constant 0 : index
    %c0_37 = arith.constant 0 : index
    %76 = vector.load %arg11[%c0_36, %c0_37] : memref<1x25xf32, #tpu.memory_space<vmem>>, vector<1x25xf32>
    %cst_38 = arith.constant 0.000000e+00 : f32
    %77 = vector.shape_cast %76 : vector<1x25xf32> to vector<1x25xf32>
    %78 = vector.broadcast %77 : vector<1x25xf32> to vector<2x25xf32>
    %79 = vector.broadcast %cst_38 : f32 to vector<2x25xf32>
    %80 = arith.select %68, %78, %79 : vector<2x25xi1>, vector<2x25xf32>
    %cst_39 = arith.constant dense<0.000000e+00> : vector<2xf32>
    %81 = vector.multi_reduction <add>, %80, %cst_39 [1] : vector<2x25xf32> to vector<2xf32>
    %82 = vector.shape_cast %81 : vector<2xf32> to vector<2x1xf32>
    %c0_40 = arith.constant 0 : index
    %c0_41 = arith.constant 0 : index
    %83 = vector.load %arg12[%c0_40, %c0_41] : memref<2x32xf32, #tpu.memory_space<vmem>>, vector<2x32xf32>
    tpu.vector_store %arg12[%c0_40, %c0_41], %51 {strides = array<i32>} : memref<2x32xf32, #tpu.memory_space<vmem>>, vector<2x32xf32>,
    %84 = tpu.concatenate %75, %82 in 1 : vector<2x1xf32>, vector<2x1xf32> -> vector<2x2xf32>
    %85 = arith.fptosi %84 : vector<2x2xf32> to vector<2x2xi32>
    %c0_42 = arith.constant 0 : index
    %c0_43 = arith.constant 0 : index
    %86 = vector.load %arg13[%c0_42, %c0_43] : memref<2x2xi32, #tpu.memory_space<vmem>>, vector<2x2xi32>
    tpu.vector_store %arg13[%c0_42, %c0_43], %85 {strides = array<i32>} : memref<2x2xi32, #tpu.memory_space<vmem>>, vector<2x2xi32>,
    return
  }
}

</mosaic_0001>

<bundles_post_ra>
// kernel: tpu_custom_call.1
= control target key start
LH: loop header
LB: loop body
LE: loop exit
PB: predicated region body
PF: predicated region fallthrough
CT: control target
= control target key end

     0   :  { %19 = vsyncpa [#allocation3], 0  ;;  %s843_s0 = inlined_call_operand.hbm [shape: f32[2,32], index: 0, kind: input, shape index: {}]   ;;  %s844_s1 = inlined_call_operand.hbm [shape: f32[2,32], index: 1, kind: input, shape index: {}]   ;;  %s845_s2 = inlined_call_operand.hbm [shape: bf16[32,32], index: 2, kind: input, shape index: {}]   ;;  %s846_s3 = inlined_call_operand.vmem [shape: f32[1,32], index: 3, kind: input, shape index: {}]   ;;  %s847_s4 = inlined_call_operand.hbm [shape: bf16[32,96], index: 4, kind: input, shape index: {}]   ;;  %s848_s5 = inlined_call_operand.hbm [shape: bf16[32,96], index: 5, kind: input, shape index: {}]   ;;  %s849_s6 = inlined_call_operand.vmem [shape: f32[1,96], index: 6, kind: input, shape index: {}]   ;;  %s850_s7 = inlined_call_operand.vmem [shape: f32[1,96], index: 7, kind: input, shape index: {}]   ;;  %s851_s8 = inlined_call_operand.hbm [shape: bf16[32,25], index: 8, kind: input, shape index: {}]   ;;  %s852_s9 = inlined_call_operand.vmem [shape: f32[1,25], index: 9, kind: input, shape index: {}]   ;;  %s853_s10 = inlined_call_operand.vmem [shape: f32[1,25], index: 10, kind: input, shape index: {}]   ;;  %s854_s11 = inlined_call_operand.vmem [shape: f32[1,25], index: 11, kind: input, shape index: {}]   ;;  %s855_s12 = inlined_call_operand.hbm [shape: f32[2,32], index: 12, kind: output, shape index: {0}]   ;;  %s856_s13 = inlined_call_operand.hbm [shape: s32[2,2], index: 13, kind: output, shape index: {1}]  }
   0x1   :  { %20 = vsyncpa [#allocation6], 0 }
   0x2   :  { %21 = vsyncpa [#allocation9], 0 }
   0x3   :  { %22 = vsyncpa [#allocation12], 0 }
   0x4   :  { %23 = vsyncpa [#allocation4], 0  ;;  %s41_s27 = sshll.u32 %s844_s1, 4  ;;  %s42_s27 = int_to_ptr.hbm [resolvable:$true] %s41_s27 }
   0x5   :  { %24 = vsyncpa [#allocation15], 0  ;;  %s698_s28 = smov [#allocation5]   ;;  %s66_s15 = sshll.u32 %s847_s4, 4  ;;  %s67_s15 = int_to_ptr.hbm [resolvable:$true] %s66_s15 }
   0x6   :  { %s43_s29 = sshll.u32 %s698_s28, 4  ;;  %s699_s16 = smov [#allocation8]   ;;  %s44_s29 = int_to_ptr.vmem [resolvable:$true] %s43_s29 }
   0x7   :  { %46 = dma.hbm_to_vmem [thread:$0]  %s42_s27, 32, %s44_s29, [#allocation6]  }
   0x8   :  { %s68_s17 = sshll.u32 %s699_s16, 4  ;;  %s30_s20 = sshll.u32 %s843_s0, 4  ;;  %s69_s17 = int_to_ptr.vmem [resolvable:$true] %s68_s17  ;;  %s31_s20 = int_to_ptr.hbm [resolvable:$true] %s30_s20 }
   0x9   :  { %s700_s1 = smov 64   ;;  %s701_s21 = smov 4  }
   0xa   :  { %74 = dma.hbm_to_vmem [thread:$0]  %s67_s15, 256, %s69_s17, [#allocation9], %s700_s1, %s700_s1, %s701_s21  }
   0xb   :  { %s51_s24 = sshll.u32 %s845_s2, 4  ;;  %s702_s25 = smov [#allocation2]   ;;  %s52_s24 = int_to_ptr.hbm [resolvable:$true] %s51_s24 }
   0xc   :  { %s32_s4 = sshll.u32 %s702_s25, 4  ;;  %s703_s26 = smov [#allocation7]   ;;  %s33_s4 = int_to_ptr.vmem [resolvable:$true] %s32_s4 }
   0xd   :  { %35 = dma.hbm_to_vmem [thread:$0]  %s31_s20, 32, %s33_s4, [#allocation3]  }
   0xe   :  { %s53_s27 = sshll.u32 %s703_s26, 4  ;;  %s79_s29 = sshll.u32 %s848_s5, 4  ;;  %s54_s27 = int_to_ptr.vmem [resolvable:$true] %s53_s27  ;;  %s80_s29 = int_to_ptr.hbm [resolvable:$true] %s79_s29 }
   0xf   :  { %59 = dma.hbm_to_vmem [thread:$0]  %s52_s24, 256, %s54_s27, [#allocation6], %s700_s1, %s700_s1, %s701_s21  }
  0x10   :  { %s96_s2 = sshll.u32 %s851_s8, 4  ;;  %s704_s15 = smov [#allocation10]   ;;  %s97_s2 = int_to_ptr.hbm [resolvable:$true] %s96_s2 }
  0x11   :  { %s81_s16 = sshll.u32 %s704_s15, 4  ;;  %s705_s17 = smov [#allocation11]   ;;  %s82_s16 = int_to_ptr.vmem [resolvable:$true] %s81_s16 }
  0x12   :  { %87 = dma.hbm_to_vmem [thread:$0]  %s80_s29, 256, %s82_s16, [#allocation9], %s700_s1, %s700_s1, %s701_s21  }
  0x13   :  { %s98_s18 = sshll.u32 %s705_s17, 4  ;;  %s99_s18 = int_to_ptr.vmem [resolvable:$true] %s98_s18 }
  0x14   :  { %104 = dma.hbm_to_vmem [thread:$0]  %s97_s2, 256, %s99_s18, [#allocation12], %s700_s1, %s700_s1, %s701_s21  }
  0x15   :  { %686 = dma.done.wait [#allocation3], 32  }
  0x16   :  { %687 = vsyncadd [#allocation3], 4294967264 }
  0x17   :  { %688 = dma.done.wait [#allocation6], 288  }
  0x18   :  { %689 = vsyncadd [#allocation6], 4294967008 }
  0x19   :  { %690 = dma.done.wait [#allocation9], 512  }
  0x1a   :  { %691 = vsyncadd [#allocation9], 4294966784 }
  0x1b   :  { %692 = dma.done.wait [#allocation12], 256  }
  0x1c   :  { %693 = vsyncadd [#allocation12], 4294967040  ;;  %v458_v0 = vld [vmem:[#allocation7 + $0x8] sm:$0xff]  ;;  %v457_v1 = vld [vmem:[#allocation7] sm:$0xff]  ;;  %vm159_vm0 = vcmask 261120   ;;  %vm336_vm5 = vcmask 197632   ;;  %v334_v59 = vlaneseq }
  0x1d   :  { %v136_v2 = vld [vmem:[#allocation2] sm:$0x3]  ;;  %v462_v3 = vld [vmem:[#allocation10 + $0x8] sm:$0xff]  ;;  %v461_v4 = vld [vmem:[#allocation10] sm:$0xff]  ;;  %169 = vmatpush.bf16.msra.mxu0 %v458_v0  ;;  %vm378_vm8 = vcmask 254976   ;;  %s392_s27 = sshll.u32 %s855_s12, 4  ;;  %s393_s27 = int_to_ptr.hbm [resolvable:$true] %s392_s27 }
  0x1e   :  { %v138_v5 = vld [vmem:[#allocation5] sm:$0x3]  ;;  %244 = vmatpush.bf16.msra.mxu2 %v462_v3  ;;  %v137_v6 = vpack.c.bf16 %v136_v2, %v136_v2  ;;  %v459_v9 = vld [vmem:[#allocation8] sm:$0xff]  ;;  %v482_v10 = vld [vmem:[%s846_s3] ss:$0 sm:$0xff]  ;;  %s706_s3 = smov 96  }
  0x1f   :  { %v214_v7 = vpack.c.bf16 %v138_v5, %v138_v5  ;;  %v460_v8 = vld [vmem:[#allocation8 + $0x8] sm:$0xff]  ;;  %v463_v45 = vld [vmem:[#allocation11] sm:$0xff]  ;;  %v335_v60 = vand.u32 127, %v334_v59  ;;  %s708_s28 = smov [#allocation13]   ;;  %vm380_vm10 = vcmask 7168   ;;  %s403_s30 = sshll.u32 %s856_s13, 4  ;;  %s404_s30 = int_to_ptr.hbm [resolvable:$true] %s403_s30 }
  0x20   :  { %207 = vmatpush.bf16.msra.mxu1 %v460_v8  ;;  %v483_v14 = vld [vmem:[%s850_s7] ss:$0 sm:$0xff]  ;;  %s390_s0 = sshll.u32 %s708_s28, 4  ;;  %vm383_vm12 = vcmask 9216   ;;  %s391_s0 = int_to_ptr.vmem [resolvable:$true] %s390_s0 }
  0x21   :  { %170 = vmatpush.bf16.msra.mxu0 %v457_v1  ;;  %v484_v20 = vld [vmem:[%s849_s6] ss:$0 sm:$0xff]  ;;  %s707_s6 = smov 32  }
  0x22   :  { %245 = vmatpush.bf16.msra.mxu2 %v461_v4  ;;  %v464_v44 = vld [vmem:[#allocation11 + $0x8] sm:$0xff] }
  0x23   :  { %327 = vmatpush.bf16.msra.mxu3 %v464_v44  ;;  %v485_v54 = vld [vmem:[%s852_s9] ss:$0 sm:$0xff] }
  0x24   :  { %429 = vmatmul.msk.bf16.vlgmr.msra.gmra.mxu0 %vm159_vm0, %v137_v6  ;;  %208 = vmatpush.bf16.msra.mxu1 %v459_v9 }
  0x25   :  { %447 = vmatmul.msk.bf16.vlgmr.msra.gmra.mxu2 %vm159_vm0, %v214_v7 }
  0x27   :  { %328 = vmatpush.bf16.msra.mxu3 %v463_v45 }
  0xa1   :  { %v172_v11 = vpop.f32.mrf.mxu0 }
  0xa2   :  { %v173_v12 = vadd.f32 %v482_v10, %v172_v11  ;;  %v486_v11 = vld [vmem:[%s853_s10] ss:$0 sm:$0xff]  ;;  %s709_s10 = smov [#allocation14]  }
  0xa4   :  { %v176_v13 = vmax.f32 %v173_v12, 0.0 }
  0xa6   :  { %v177_v15 = vpack.c.bf16 %v176_v13, %v176_v13 }
  0xa8   :  { %438 = vmatmul.msk.bf16.vlgmr.msra.gmra.mxu1 %vm159_vm0, %v177_v15  ;;  %v247_v16 = vpop.f32.mrf.mxu2  ;;  %v487_v15 = vld [vmem:[%s854_s11] ss:$0 sm:$0xff]  ;;  %s401_s11 = sshll.u32 %s709_s10, 4  ;;  %s402_s11 = int_to_ptr.vmem [resolvable:$true] %s401_s11 }
  0xa9   :  { %v174_v17 = vpop.f32.mrf.mxu0  ;;  %v248_v18 = vadd.f32 %v483_v14, %v247_v16 }
  0xab   :  { %272 = vrot.lane.b32.xlu0 %v248_v18, %s700_s1 }
  0xb0   :  { %v249_v19 = vpop.f32.mrf.mxu2 }
 0x11d   :  { %v273_v36 = vpop.permute.xlu0 %272 }
 0x125   :  { %v210_v21 = vpop.f32.mrf.mxu1 }
 0x126   :  { %v211_v22 = vadd.f32 %v484_v20, %v210_v21 }
 0x128   :  { %v251_v23 = vadd.f32 %v248_v18, %v211_v22 }
 0x12a   :  { %v252_v24 = vsub.f32 0.0, %v251_v23 }
 0x12c   :  { %v253_v25 = vmul.f32 1.442695, %v252_v24 }
 0x12d   :  { %v212_v26 = vpop.f32.mrf.mxu1 }
 0x12e   :  { %488 = vpow2.f32 %v253_v25 }
 0x134   :  { %v489_v27 = vpop.eup %488 }
 0x135   :  { %v255_v28 = vadd.f32 1.0, %v489_v27 }
 0x137   :  { %490 = vrcp.f32 %v255_v28  ;;  %v267_v32 = vand.u32 2147483648, %v255_v28  ;;  %v265_v34 = vand.u32 2147483647, %v255_v28  ;;  %vm261_vm2 = vweird.f32 %v255_v28 }
 0x139   :  { %v268_v37 = vor.u32 1.1754944e-38, %v267_v32  ;;  %vm266_vm4 = vcmp.eq.f32.partialorder %v265_v34, 8.507059e+37 }
 0x13d   :  { %v491_v29 = vpop.eup %490 }
 0x13e   :  { %v257_v30 = vmul.f32 %v491_v29, %v255_v28  ;;  %vm262_vm1 = vweird.f32 %v491_v29 }
 0x13f   :  { %vm263_vm3 = vmor %vm261_vm2, %vm262_vm1 }
 0x140   :  { %v258_v31 = vsub.f32 1.0, %v257_v30 }
 0x142   :  { %v259_v33 = vmul.f32 %v491_v29, %v258_v31 }
 0x144   :  { %v260_v35 = vadd.f32 %v491_v29, %v259_v33 }
 0x146   :  { %v264_v38 = vsel %vm263_vm3, %v491_v29, %v260_v35 }
 0x147   :  { %v269_v39 = vsel %vm266_vm4, %v268_v37, %v264_v38 }
 0x148   :  { %v275_v40 = vmul.f32 %v273_v36, %v269_v39  ;;  %v282_v47 = vsub.f32 1.0, %v269_v39 }
 0x14a   :  { %277 = vrot.lane.b32.xlu0 %v275_v40, %s700_s1 }
 0x1bc   :  { %v278_v41 = vpop.permute.xlu0 %277 }
 0x1bd   :  { %v280_v42 = vadd.f32 %v278_v41, %v211_v22 }
 0x1bf   :  { %492 = vtanh.f32 %v280_v42 }
 0x1c5   :  { %v493_v43 = vpop.eup %492 }
 0x1c6   :  { %284 = vrot.lane.b32.xlu1 %v493_v43, %s706_s3 }
 0x1ce   :  { %289 = vrot.lane.b32.xlu1 %v138_v5, %s707_s6 }
 0x238   :  { %v285_v46 = vpop.permute.xlu1 %284 }
 0x239   :  { %v287_v49 = vmul.f32 %v285_v46, %v282_v47 }
 0x240   :  { %v290_v48 = vpop.permute.xlu1 %289 }
 0x241   :  { %v292_v50 = vmul.f32 %v290_v48, %v269_v39 }
 0x243   :  { %v293_v51 = vadd.f32 %v292_v50, %v287_v49 }
 0x245   :  { %v294_v52 = vpack.c.bf16 %v293_v51, %v293_v51 }
 0x247   :  { %304 = vrot.lane.b32.xlu2 %v294_v52, %s706_s3 }
 0x2a1   :  { %v305_v53 = vpop.permute.xlu2 %304 }
 0x2a2   :  { %456 = vmatmul.msk.bf16.vlgmr.msra.gmra.mxu3 %vm159_vm0, %v305_v53 }
 0x325   :  { %v330_v55 = vpop.f32.mrf.mxu3 }
 0x326   :  { %v331_v56 = vadd.f32 %v485_v54, %v330_v55 }
 0x328   :  { %v337_v57 = vsel %vm336_vm5, %v331_v56, -inf }
 0x329   :  { %338 = vmax.xlane.f32.xlu2 %v337_v57 }
 0x32d   :  { %v332_v58 = vpop.f32.mrf.mxu3 }
 0x39c   :  { %v339_v61 = vpop.xlane.xlu2 %338 }
 0x39d   :  { %vm340_vm6 = vcmp.ge.f32.partialorder %v331_v56, %v339_v61 }
 0x39e   :  { %v341_v62 = vsel %vm340_vm6, %v335_v60, 25 }
 0x39f   :  { %v342_v63 = vsel %vm336_vm5, %v341_v62, 2147483647 }
 0x3a0   :  { %v344_v0 = vshra.s32 %v342_v63, 16  ;;  %v343_v2 = vand.u32 65535, %v342_v63 }
 0x3a2   :  { %v346_v1 = vcvt.s32.f32 %v344_v0  ;;  %v345_v4 = vcvt.s32.f32 %v343_v2 }
 0x3a4   :  { %347 = vmin.xlane.f32.xlu0 %v346_v1 }
 0x3b8   :  { %375 = vrot.lane.b32.xlu0 %v293_v51, %s706_s3 }
 0x417   :  { %v348_v3 = vpop.xlane.xlu0 %347 }
 0x418   :  { %vm349_vm7 = vcmp.eq.f32.partialorder %v346_v1, %v348_v3  ;;  %v354_v7 = vcvt.f32.s32 %v348_v3 }
 0x419   :  { %v350_v5 = vsel %vm349_vm7, %v345_v4, inf }
 0x41a   :  { %351 = vmin.xlane.f32.xlu1 %v350_v5  ;;  %v355_v9 = vshll.u32 %v354_v7, 16 }
 0x42a   :  { %v376_v6 = vpop.permute.xlu0 %375 }
 0x42b   :  { %379 = vst.msk [vmem:[#allocation13] sm:$0x3] %vm378_vm8, %v376_v6 }
 0x42c   :  { %395 = dma.vmem_to_hbm [thread:$0]  %s391_s0, 32, %s393_s27, [#allocation4]  }
 0x48d   :  { %v352_v8 = vpop.xlane.xlu1 %351 }
 0x48e   :  { %v353_v10 = vcvt.f32.s32 %v352_v8 }
 0x490   :  { %v356_v12 = vadd.s32 %v355_v9, %v353_v10 }
 0x492   :  { %vm357_vm9 = vcmp.eq.s32.totalorder %v335_v60, %v356_v12 }
 0x493   :  { %v362_v13 = vsel %vm357_vm9, %v486_v11, 0.0  ;;  %v370_v16 = vsel %vm357_vm9, %v487_v15, 0.0 }
 0x494   :  { %v363_v14 = vsel %vm336_vm5, %v362_v13, 0.0  ;;  %v371_v17 = vsel %vm336_vm5, %v370_v16, 0.0 }
 0x495   :  { %364 = vadd.xlane.f32.xlu2 %v363_v14 }
 0x49d   :  { %372 = vadd.xlane.f32.xlu2 %v371_v17 }
 0x508   :  { %v365_v18 = vpop.xlane.xlu2 %364 }
 0x510   :  { %v373_v19 = vpop.xlane.xlu2 %372 }
 0x511   :  { %v381_v20 = vsel %vm380_vm10, %v365_v18, %v373_v19 }
 0x512   :  { %vm465_vm11 = vcmp.lt.s32.totalorder %v381_v20, 0  ;;  %v466_v21 = vceil.f32 %v381_v20  ;;  %v467_v22 = vfloor.f32 %v381_v20 }
 0x514   :  { %v468_v23 = vsel %vm465_vm11, %v466_v21, %v467_v22 }
 0x515   :  { %v469_v24 = vcvt.f32.s32 %v468_v23 }
 0x517   :  { %384 = vst.msk [vmem:[#allocation14] sm:$0x3] %vm383_vm12, %v469_v24 }
 0x518   :  { %406 = dma.vmem_to_hbm [thread:$0]  %s402_s11, 32, %s404_s30, [#allocation15]  }
 0x519   :  { %694 = dma.done.wait [#allocation4], 32  }
 0x51a   :  { %695 = vsyncadd [#allocation4], 4294967264 }
 0x51b   :  { %696 = dma.done.wait [#allocation15], 32  }
 0x51c   :  { %697 = vsyncadd [#allocation15], 4294967264 }
 0x51d   :  { %415 = vsyncpa [#allocation3], 1 }
 0x51e   :  { %416 = vsyncpa [#allocation6], 1 }
 0x51f   :  { %417 = vsyncpa [#allocation9], 1 }
 0x520   :  { %418 = vsyncpa [#allocation12], 1 }
 0x521   :  { %419 = vsyncpa [#allocation4], 1 }
 0x522   :  { %420 = vsyncpa [#allocation15], 1 }

</bundles_post_ra>
